<compile_context>
chip_gen: v7x
topology: tpu7x:2x2x1
jax: 0.10.0
libtpu: 0.0.40
codegen_flags: <defaults>
</compile_context>

<pallas_src>
import functools

import jax
import jax.numpy as jnp
import numpy as np
from jax.experimental import pallas as pl
from jax.experimental.pallas import tpu as pltpu

EPS = 1e-5                          # nn.BatchNorm2d default eps
VMEM_LIMIT = 32 * 1024 * 1024       # explicit scoped-VMEM budget (safe v5e/v6e/v7x)


def _row_tile(rows: int) -> int:
    """Row tile: multiple of 8 (sublane) dividing `rows`, small enough that
    double-buffered input+output tiles stay far below the v7x 64 MiB VMEM."""
    if rows % 8 == 0 and rows > 8:
        return 8
    return rows


# --------------------- pass 1: conv (1 matmul) + BN stats -------------------- #

def conv_stats_kernel(p_ref, w_ref, y_ref, s_ref):
    """3x3 conv for one row tile as a single MXU matmul (taps folded into K),
    plus per-channel sum / sum-of-squares accumulation for global BN stats.

    p_ref: (1, TH, W, 9*Cin)  im2col patches           (VMEM)
    w_ref: (9*Cin, Cout)      folded conv weights       (VMEM)
    y_ref: (1, TH, W, Cout)   pre-BN conv output        (VMEM)
    s_ref: (1, 2, Cout)       [sum, sumsq] accumulator  (VMEM, resident across
                              the row axis; one block per batch index)
    """
    _, TH, W, K = p_ref.shape
    Cout = w_ref.shape[1]

    patches = p_ref[0].reshape(TH * W, K)                    # (TH*W, 9*Cin)
    acc = jnp.dot(patches, w_ref[...],
                  preferred_element_type=jnp.float32)        # (TH*W, Cout)

    @pl.when(pl.program_id(1) == 0)
    def _init():
        s_ref[...] = jnp.zeros_like(s_ref)

    psum = jnp.sum(acc, axis=0, keepdims=True)               # (1, Cout)
    psq = jnp.sum(acc * acc, axis=0, keepdims=True)          # (1, Cout)
    s_ref[...] += jnp.concatenate([psum, psq], axis=0)[None]

    y_ref[0] = acc.reshape(TH, W, Cout)


# --------------- pass 2: normalize + ReLU (+ fused MaxPool 2x2) -------------- #

def bn_relu_kernel(y_ref, sc_ref, sh_ref, o_ref):
    """normalize + ReLU.  y_ref/o_ref: (1, TH, W, C); sc/sh: (1, C)."""
    o_ref[0] = jnp.maximum(y_ref[0] * sc_ref[...] + sh_ref[...], 0.0)


def bn_relu_pool_kernel(y_ref, sc_ref, sh_ref, o_ref):
    """normalize + ReLU + fused MaxPool2d(2,2).

    y_ref: (1, THp, 2, W//2, 2*C)  conv output with the H row-pair split out
                                   and the W pair folded into the channel dim
                                   (pure row-major wrapper reshape, no copy)
    sc/sh: (1, 2*C)                per-channel scale/shift tiled for the W pair
    o_ref: (1, THp, W//2, C)
    """
    C = o_ref.shape[-1]
    z = jnp.maximum(y_ref[0] * sc_ref[...] + sh_ref[...], 0.0)
    z = jnp.maximum(z[:, 0], z[:, 1])                    # max over the H pair
    o_ref[0] = jnp.maximum(z[:, :, :C], z[:, :, C:])     # max over the W pair


# ------------------------------- wrapper (glue) ------------------------------ #

@functools.partial(jax.jit, static_argnames=("is_pool",))
def conv_block(x_nchw, w_oihw, gamma, beta, *, is_pool=False):
    """ConvBlock.forward.  x: (N, Cin, H, W) NCHW -> (N, Cout, H', W') NCHW."""
    N, Cin, H, W = x_nchw.shape
    Cout = w_oihw.shape[0]
    K9 = 9 * Cin
    if is_pool:
        assert H % 2 == 0 and W % 2 == 0, "MaxPool2d(2,2) path expects even H, W"

    # Interface glue: NCHW -> NHWC, 'same' pad, fold 3x3 taps into K (im2col).
    x = jnp.transpose(x_nchw, (0, 2, 3, 1)).astype(jnp.float32)          # NHWC
    xpad = jnp.pad(x, ((0, 0), (1, 1), (1, 1), (0, 0)))
    patches = jnp.concatenate(
        [xpad[:, kh:kh + H, kw:kw + W, :] for kh in range(3) for kw in range(3)],
        axis=-1)                                                          # (N,H,W,9Cin)
    wmat = jnp.transpose(w_oihw, (2, 3, 1, 0)).astype(jnp.float32)        # (3,3,Cin,Cout)
    wmat = wmat.reshape(K9, Cout)

    # ---- pass 1: conv + global BN sum/sumsq --------------------------------
    TH = _row_tile(H)
    y, stats = pl.pallas_call(
        conv_stats_kernel,
        grid=(N, H // TH),
        in_specs=[
            pl.BlockSpec((1, TH, W, K9), lambda n, h: (n, h, 0, 0)),
            pl.BlockSpec((K9, Cout), lambda n, h: (0, 0)),
        ],
        out_specs=(
            pl.BlockSpec((1, TH, W, Cout), lambda n, h: (n, h, 0, 0)),
            pl.BlockSpec((1, 2, Cout), lambda n, h: (n, 0, 0)),
        ),
        out_shape=(
            jax.ShapeDtypeStruct((N, H, W, Cout), jnp.float32),
            jax.ShapeDtypeStruct((N, 2, Cout), jnp.float32),
        ),
        compiler_params=pltpu.CompilerParams(
            dimension_semantics=("parallel", "arbitrary"),
            vmem_limit_bytes=VMEM_LIMIT),
    )(patches, wmat)

    # Tiny O(Cout) finalize: global batch stats -> affine scale/shift.
    cnt = jnp.float32(N * H * W)
    mean = jnp.sum(stats[:, 0, :], axis=0) / cnt
    var = jnp.maximum(jnp.sum(stats[:, 1, :], axis=0) / cnt - mean * mean, 0.0)
    scale = gamma.astype(jnp.float32) * jax.lax.rsqrt(var + EPS)
    shift = beta.astype(jnp.float32) - mean * scale

    # ---- pass 2: normalize + ReLU (+ fused MaxPool2d(2,2)) ------------------
    if is_pool:
        Hp, Wp = H // 2, W // 2
        y5 = y.reshape(N, Hp, 2, Wp, 2 * Cout)        # free row-major reshape
        sc = jnp.tile(scale, 2).reshape(1, 2 * Cout)
        sh = jnp.tile(shift, 2).reshape(1, 2 * Cout)
        THp = _row_tile(Hp)
        out = pl.pallas_call(
            bn_relu_pool_kernel,
            grid=(N, Hp // THp),
            in_specs=[
                pl.BlockSpec((1, THp, 2, Wp, 2 * Cout),
                             lambda n, h: (n, h, 0, 0, 0)),
                pl.BlockSpec((1, 2 * Cout), lambda n, h: (0, 0)),
                pl.BlockSpec((1, 2 * Cout), lambda n, h: (0, 0)),
            ],
            out_specs=pl.BlockSpec((1, THp, Wp, Cout), lambda n, h: (n, h, 0, 0)),
            out_shape=jax.ShapeDtypeStruct((N, Hp, Wp, Cout), jnp.float32),
            compiler_params=pltpu.CompilerParams(
                dimension_semantics=("parallel", "parallel"),
                vmem_limit_bytes=VMEM_LIMIT),
        )(y5, sc, sh)
    else:
        sc = scale.reshape(1, Cout)
        sh = shift.reshape(1, Cout)
        TH2 = _row_tile(H)
        out = pl.pallas_call(
            bn_relu_kernel,
            grid=(N, H // TH2),
            in_specs=[
                pl.BlockSpec((1, TH2, W, Cout), lambda n, h: (n, h, 0, 0)),
                pl.BlockSpec((1, Cout), lambda n, h: (0, 0)),
                pl.BlockSpec((1, Cout), lambda n, h: (0, 0)),
            ],
            out_specs=pl.BlockSpec((1, TH2, W, Cout), lambda n, h: (n, h, 0, 0)),
            out_shape=jax.ShapeDtypeStruct((N, H, W, Cout), jnp.float32),
            compiler_params=pltpu.CompilerParams(
                dimension_semantics=("parallel", "parallel"),
                vmem_limit_bytes=VMEM_LIMIT),
        )(y, sc, sh)

    return jnp.transpose(out, (0, 3, 1, 2))   # back to the module's NCHW


# ------------------------------ pure-JAX reference -------------------------- #

def conv_block_ref(x_nchw, w_oihw, gamma, beta, *, is_pool=False):
    y = jax.lax.conv_general_dilated(
        x_nchw.astype(jnp.float32), w_oihw.astype(jnp.float32),
        window_strides=(1, 1), padding=((1, 1), (1, 1)),
        dimension_numbers=('NCHW', 'OIHW', 'NCHW'))
    mean = jnp.mean(y, axis=(0, 2, 3), keepdims=True)
    var = jnp.mean((y - mean) ** 2, axis=(0, 2, 3), keepdims=True)
    y = (y - mean) * jax.lax.rsqrt(var + EPS)
    y = y * gamma.reshape(1, -1, 1, 1) + beta.reshape(1, -1, 1, 1)
    y = jnp.maximum(y, 0.0)
    if is_pool:
        y = jax.lax.reduce_window(y, -jnp.inf, jax.lax.max,
                                  (1, 1, 2, 2), (1, 1, 2, 2), 'VALID')
    return y


# ----------------------------------- main ----------------------------------- #

if __name__ == "__main__":
    key = jax.random.PRNGKey(0)
    k_x, k_w = jax.random.split(key)

    N, Cin, Cout, H, W = 2, 4, 8, 16, 16
    x = jax.random.normal(k_x, (N, Cin, H, W), dtype=jnp.float32)

    # Deterministic Kaiming-uniform init (a=0): bound = sqrt(6 / fan_in)
    fan_in = Cin * 3 * 3
    bound = float(np.sqrt(6.0 / fan_in))
    w = jax.random.uniform(k_w, (Cout, Cin, 3, 3), dtype=jnp.float32,
                           minval=-bound, maxval=bound)

    # BatchNorm2d default affine params
    gamma = jnp.ones((Cout,), jnp.float32)
    beta = jnp.zeros((Cout,), jnp.float32)

    for is_pool in (True, False):
        out = jax.block_until_ready(conv_block(x, w, gamma, beta, is_pool=is_pool))
        ref = jax.block_until_ready(conv_block_ref(x, w, gamma, beta, is_pool=is_pool))
        expect = (N, Cout, H // 2, W // 2) if is_pool else (N, Cout, H, W)
        assert out.shape == expect, out.shape
        np.testing.assert_allclose(np.asarray(out), np.asarray(ref),
                                   rtol=1e-4, atol=1e-4)

    print("KERNEL_OK")
</pallas_src>

<mosaic_0001>
module attributes {stable_mosaic.version = 11 : i64} {
  func.func @conv_stats_kernel(%arg0: i32, %arg1: i32, %arg2: memref<1x8x16x36xf32, #tpu.memory_space<vmem>>, %arg3: memref<36x8xf32, #tpu.memory_space<vmem>>, %arg4: memref<1x8x16x8xf32, #tpu.memory_space<vmem>>, %arg5: memref<1x2x8xf32, #tpu.memory_space<vmem>>) attributes {dimension_semantics = [#tpu.dimension_semantics<parallel>, #tpu.dimension_semantics<arbitrary>], iteration_bounds = array<i64: 2, 2>, scalar_prefetch = 0 : i64, scratch_operands = 0 : i64, tpu.core_type = #tpu.core_type<tc>, window_params = [{transform_indices = @transform_0, window_bounds = array<i64: 1, 8, 16, 36>}, {pipeline_mode = #tpu.pipeline_mode<synchronous>, transform_indices = @transform_1, window_bounds = array<i64: 36, 8>}, {transform_indices = @transform_2, window_bounds = array<i64: 1, 8, 16, 8>}, {transform_indices = @transform_3, window_bounds = array<i64: 1, 2, 8>}]} {
    %c0 = arith.constant 0 : index
    %c0_0 = arith.constant 0 : index
    %c0_1 = arith.constant 0 : index
    %c0_2 = arith.constant 0 : index
    %0 = vector.load %arg2[%c0, %c0_0, %c0_1, %c0_2] : memref<1x8x16x36xf32, #tpu.memory_space<vmem>>, vector<1x8x16x36xf32>
    %1 = vector.shape_cast %0 : vector<1x8x16x36xf32> to vector<8x16x36xf32>
    %2 = vector.shape_cast %1 : vector<8x16x36xf32> to vector<128x36xf32>
    %c0_3 = arith.constant 0 : index
    %c0_4 = arith.constant 0 : index
    %3 = vector.load %arg3[%c0_3, %c0_4] : memref<36x8xf32, #tpu.memory_space<vmem>>, vector<36x8xf32>
    %cst = arith.constant dense<0.000000e+00> : vector<128x8xf32>
    %4 = tpu.matmul %2, %3, %cst {dimension_numbers = #tpu.dot_dimension_numbers<[1], [0], [0], [1], [0, 0, 1, 1], [], []>} : vector<128x36xf32>, vector<36x8xf32>, vector<128x8xf32> -> vector<128x8xf32>
    %c0_i32 = arith.constant 0 : i32
    %5 = arith.cmpi eq, %arg1, %c0_i32 : i32
    %6 = arith.extui %5 : i1 to i32
    %c0_i32_5 = arith.constant 0 : i32
    %7 = arith.cmpi ne, %6, %c0_i32_5 : i32
    scf.if %7 {
      %cst_18 = arith.constant 0.000000e+00 : f32
      %22 = vector.broadcast %cst_18 : f32 to vector<1x2x8xf32>
      %c0_19 = arith.constant 0 : index
      %c0_20 = arith.constant 0 : index
      %c0_21 = arith.constant 0 : index
      %23 = vector.load %arg5[%c0_19, %c0_20, %c0_21] : memref<1x2x8xf32, #tpu.memory_space<vmem>>, vector<1x2x8xf32>
      tpu.vector_store %arg5[%c0_19, %c0_20, %c0_21], %22 {strides = array<i32>} : memref<1x2x8xf32, #tpu.memory_space<vmem>>, vector<1x2x8xf32>,
    } else {
    }
    %cst_6 = arith.constant dense<0.000000e+00> : vector<8xf32>
    %8 = vector.multi_reduction <add>, %4, %cst_6 [0] : vector<128x8xf32> to vector<8xf32>
    %9 = vector.shape_cast %8 : vector<8xf32> to vector<1x8xf32>
    %10 = arith.mulf %4, %4 : vector<128x8xf32>
    %cst_7 = arith.constant dense<0.000000e+00> : vector<8xf32>
    %11 = vector.multi_reduction <add>, %10, %cst_7 [0] : vector<128x8xf32> to vector<8xf32>
    %12 = vector.shape_cast %11 : vector<8xf32> to vector<1x8xf32>
    %c0_8 = arith.constant 0 : index
    %c0_9 = arith.constant 0 : index
    %c0_10 = arith.constant 0 : index
    %13 = vector.load %arg5[%c0_8, %c0_9, %c0_10] : memref<1x2x8xf32, #tpu.memory_space<vmem>>, vector<1x2x8xf32>
    %14 = tpu.concatenate %9, %12 in 0 : vector<1x8xf32>, vector<1x8xf32> -> vector<2x8xf32>
    %15 = vector.shape_cast %14 : vector<2x8xf32> to vector<1x2x8xf32>
    %16 = arith.addf %13, %15 : vector<1x2x8xf32>
    %c0_11 = arith.constant 0 : index
    %c0_12 = arith.constant 0 : index
    %c0_13 = arith.constant 0 : index
    %17 = vector.load %arg5[%c0_11, %c0_12, %c0_13] : memref<1x2x8xf32, #tpu.memory_space<vmem>>, vector<1x2x8xf32>
    tpu.vector_store %arg5[%c0_11, %c0_12, %c0_13], %16 {strides = array<i32>} : memref<1x2x8xf32, #tpu.memory_space<vmem>>, vector<1x2x8xf32>,
    %18 = vector.shape_cast %4 : vector<128x8xf32> to vector<8x16x8xf32>
    %c0_14 = arith.constant 0 : index
    %c0_15 = arith.constant 0 : index
    %c0_16 = arith.constant 0 : index
    %c0_17 = arith.constant 0 : index
    %19 = vector.load %arg4[%c0_14, %c0_15, %c0_16, %c0_17] : memref<1x8x16x8xf32, #tpu.memory_space<vmem>>, vector<1x8x16x8xf32>
    %20 = vector.shape_cast %19 : vector<1x8x16x8xf32> to vector<8x16x8xf32>
    %21 = vector.shape_cast %18 : vector<8x16x8xf32> to vector<1x8x16x8xf32>
    tpu.vector_store %arg4[%c0_14, %c0_15, %c0_16, %c0_17], %21 {strides = array<i32>} : memref<1x8x16x8xf32, #tpu.memory_space<vmem>>, vector<1x8x16x8xf32>,
    return
  }
  func.func @transform_0(%arg0: i32, %arg1: i32) -> (i32, i32, i32, i32) {
    %c0_i32 = arith.constant 0 : i32
    %c0_i32_0 = arith.constant 0 : i32
    %c0_i32_1 = arith.constant 0 : i32
    return %arg0, %arg1, %c0_i32, %c0_i32_0 : i32, i32, i32, i32
  }
  func.func @transform_1(%arg0: i32, %arg1: i32) -> (i32, i32) {
    %c0_i32 = arith.constant 0 : i32
    %c0_i32_0 = arith.constant 0 : i32
    %c0_i32_1 = arith.constant 0 : i32
    return %c0_i32, %c0_i32_0 : i32, i32
  }
  func.func @transform_2(%arg0: i32, %arg1: i32) -> (i32, i32, i32, i32) {
    %c0_i32 = arith.constant 0 : i32
    %c0_i32_0 = arith.constant 0 : i32
    %c0_i32_1 = arith.constant 0 : i32
    return %arg0, %arg1, %c0_i32, %c0_i32_0 : i32, i32, i32, i32
  }
  func.func @transform_3(%arg0: i32, %arg1: i32) -> (i32, i32, i32) {
    %c0_i32 = arith.constant 0 : i32
    %c0_i32_0 = arith.constant 0 : i32
    %c0_i32_1 = arith.constant 0 : i32
    return %arg0, %c0_i32, %c0_i32_0 : i32, i32, i32
  }
}

module attributes {stable_mosaic.version = 11 : i64} {
  func.func @bn_relu_pool_kernel(%arg0: i32, %arg1: i32, %arg2: memref<1x8x2x8x16xf32, #tpu.memory_space<vmem>>, %arg3: memref<1x16xf32, #tpu.memory_space<vmem>>, %arg4: memref<1x16xf32, #tpu.memory_space<vmem>>, %arg5: memref<1x8x8x8xf32, #tpu.memory_space<vmem>>) attributes {dimension_semantics = [#tpu.dimension_semantics<parallel>, #tpu.dimension_semantics<parallel>], iteration_bounds = array<i64: 2, 1>, scalar_prefetch = 0 : i64, scratch_operands = 0 : i64, tpu.core_type = #tpu.core_type<tc>, window_params = [{transform_indices = @transform_0, window_bounds = array<i64: 1, 8, 2, 8, 16>}, {pipeline_mode = #tpu.pipeline_mode<synchronous>, transform_indices = @transform_1, window_bounds = array<i64: 1, 16>}, {pipeline_mode = #tpu.pipeline_mode<synchronous>, transform_indices = @transform_2, window_bounds = array<i64: 1, 16>}, {transform_indices = @transform_3, window_bounds = array<i64: 1, 8, 8, 8>}]} {
    %c0 = arith.constant 0 : index
    %c0_0 = arith.constant 0 : index
    %c0_1 = arith.constant 0 : index
    %c0_2 = arith.constant 0 : index
    %c0_3 = arith.constant 0 : index
    %0 = vector.load %arg2[%c0, %c0_0, %c0_1, %c0_2, %c0_3] : memref<1x8x2x8x16xf32, #tpu.memory_space<vmem>>, vector<1x8x2x8x16xf32>
    %1 = vector.shape_cast %0 : vector<1x8x2x8x16xf32> to vector<8x2x8x16xf32>
    %c0_4 = arith.constant 0 : index
    %c0_5 = arith.constant 0 : index
    %2 = vector.load %arg3[%c0_4, %c0_5] : memref<1x16xf32, #tpu.memory_space<vmem>>, vector<1x16xf32>
    %3 = vector.shape_cast %2 : vector<1x16xf32> to vector<1x1x1x16xf32>
    %4 = vector.broadcast %3 : vector<1x1x1x16xf32> to vector<8x2x8x16xf32>
    %5 = arith.mulf %1, %4 : vector<8x2x8x16xf32>
    %c0_6 = arith.constant 0 : index
    %c0_7 = arith.constant 0 : index
    %6 = vector.load %arg4[%c0_6, %c0_7] : memref<1x16xf32, #tpu.memory_space<vmem>>, vector<1x16xf32>
    %7 = vector.shape_cast %6 : vector<1x16xf32> to vector<1x1x1x16xf32>
    %8 = vector.broadcast %7 : vector<1x1x1x16xf32> to vector<8x2x8x16xf32>
    %9 = arith.addf %5, %8 : vector<8x2x8x16xf32>
    %cst = arith.constant 0.000000e+00 : f32
    %10 = vector.broadcast %cst : f32 to vector<8x2x8x16xf32>
    %11 = arith.maximumf %9, %10 : vector<8x2x8x16xf32>
    %12 = vector.extract_strided_slice %11 {offsets = [0, 0, 0, 0], sizes = [8, 1, 8, 16], strides = [1, 1, 1, 1]} : vector<8x2x8x16xf32> to vector<8x1x8x16xf32>
    %13 = vector.shape_cast %12 : vector<8x1x8x16xf32> to vector<8x8x16xf32>
    %14 = vector.extract_strided_slice %11 {offsets = [0, 1, 0, 0], sizes = [8, 1, 8, 16], strides = [1, 1, 1, 1]} : vector<8x2x8x16xf32> to vector<8x1x8x16xf32>
    %15 = vector.shape_cast %14 : vector<8x1x8x16xf32> to vector<8x8x16xf32>
    %16 = arith.maximumf %13, %15 : vector<8x8x16xf32>
    %17 = vector.extract_strided_slice %16 {offsets = [0, 0, 0], sizes = [8, 8, 8], strides = [1, 1, 1]} : vector<8x8x16xf32> to vector<8x8x8xf32>
    %18 = vector.extract_strided_slice %16 {offsets = [0, 0, 8], sizes = [8, 8, 8], strides = [1, 1, 1]} : vector<8x8x16xf32> to vector<8x8x8xf32>
    %19 = arith.maximumf %17, %18 : vector<8x8x8xf32>
    %c0_8 = arith.constant 0 : index
    %c0_9 = arith.constant 0 : index
    %c0_10 = arith.constant 0 : index
    %c0_11 = arith.constant 0 : index
    %20 = vector.load %arg5[%c0_8, %c0_9, %c0_10, %c0_11] : memref<1x8x8x8xf32, #tpu.memory_space<vmem>>, vector<1x8x8x8xf32>
    %21 = vector.shape_cast %20 : vector<1x8x8x8xf32> to vector<8x8x8xf32>
    %22 = vector.shape_cast %19 : vector<8x8x8xf32> to vector<1x8x8x8xf32>
    tpu.vector_store %arg5[%c0_8, %c0_9, %c0_10, %c0_11], %22 {strides = array<i32>} : memref<1x8x8x8xf32, #tpu.memory_space<vmem>>, vector<1x8x8x8xf32>,
    return
  }
  func.func @transform_0(%arg0: i32, %arg1: i32) -> (i32, i32, i32, i32, i32) {
    %c0_i32 = arith.constant 0 : i32
    %c0_i32_0 = arith.constant 0 : i32
    %c0_i32_1 = arith.constant 0 : i32
    %c0_i32_2 = arith.constant 0 : i32
    return %arg0, %arg1, %c0_i32, %c0_i32_0, %c0_i32_1 : i32, i32, i32, i32, i32
  }
  func.func @transform_1(%arg0: i32, %arg1: i32) -> (i32, i32) {
    %c0_i32 = arith.constant 0 : i32
    %c0_i32_0 = arith.constant 0 : i32
    %c0_i32_1 = arith.constant 0 : i32
    return %c0_i32, %c0_i32_0 : i32, i32
  }
  func.func @transform_2(%arg0: i32, %arg1: i32) -> (i32, i32) {
    %c0_i32 = arith.constant 0 : i32
    %c0_i32_0 = arith.constant 0 : i32
    %c0_i32_1 = arith.constant 0 : i32
    return %c0_i32, %c0_i32_0 : i32, i32
  }
  func.func @transform_3(%arg0: i32, %arg1: i32) -> (i32, i32, i32, i32) {
    %c0_i32 = arith.constant 0 : i32
    %c0_i32_0 = arith.constant 0 : i32
    %c0_i32_1 = arith.constant 0 : i32
    return %arg0, %arg1, %c0_i32, %c0_i32_0 : i32, i32, i32, i32
  }
}

</mosaic_0001>

<bundles_post_ra>
// kernel: tile.13
= control target key start
LH: loop header
LB: loop body
LE: loop exit
PB: predicated region body
PF: predicated region fallthrough
CT: control target
= control target key end

     0   :  { %s22_s0 = inlined_call_operand.vmem [shape: f32[8], index: 0, kind: input, shape index: {}]   ;;  %s23_s1 = inlined_call_operand.vmem [shape: f32[2,8], index: 1, kind: output, shape index: {}]  }
   0x1   :  { %v4_v0 = vld [vmem:[%s22_s0] ss:$0 sm:$0xff] }
   0x2   :  { %5 = vst [vmem:[%s23_s1] sm:$0x3] %v4_v0 }

// kernel: tile.14
= control target key start
LH: loop header
LB: loop body
LE: loop exit
PB: predicated region body
PF: predicated region fallthrough
CT: control target
= control target key end

     0   :  { %vm7_vm0 = vcmask 64512   ;;  %vm13_vm1 = vcmask 130112   ;;  %s39_s0 = inlined_call_operand.vmem [shape: f32[2,8], index: 0, kind: input, shape index: {}]   ;;  %s40_s1 = inlined_call_operand.vmem [shape: f32[1,16], index: 1, kind: output, shape index: {}]  }
   0x1   :  { %v4_v0 = vld [vmem:[%s39_s0] sm:$0x3]  ;;  %s22_s0 = smov 8  }
   0x2   :  { %5 = vst [vmem:[#allocation1] sm:$0x3] %v4_v0 }
   0x9   :  { %v10_v1 = vld [vmem:[#allocation1 + $0x1] sm:$0x1]   ;;  %v6_v2 = vld [vmem:[#allocation1] sm:$0x1]  }
   0xa   :  { %11 = vrot.lane.b32.xlu0 %v10_v1, %s22_s0  ;;  %8 = vst.msk [vmem:[#allocation0] sm:$0x1] %vm7_vm0, %v6_v2  }
  0x7c   :  { %v12_v3 = vpop.permute.xlu0 %11  }
  0x7d   :  { %14 = vst.msk [vmem:[#allocation0] sm:$0x1] %vm13_vm1, %v12_v3  }
  0x84   :  { %v18_v4 = vld [vmem:[#allocation0] sm:$0x1] }
  0x85   :  { %20 = vst [vmem:[%s40_s1] sm:$0x1] %v18_v4 }

// kernel: conv_block.2
= control target key start
LH: loop header
LB: loop body
LE: loop exit
PB: predicated region body
PF: predicated region fallthrough
CT: control target
= control target key end

     0   :  { %s899_s12 = smov 0   ;;  %s901_s13 = smov 0   ;;  %s1129_s0 = inlined_call_operand.vmem [shape: f32[2,16,16,36], index: 0, kind: input, shape index: {}]   ;;  %s1130_s1 = inlined_call_operand.vmem [shape: f32[36,8], index: 1, kind: input, shape index: {}]   ;;  %s1131_s2 = inlined_call_operand.vmem [shape: f32[2,16,16,8], index: 2, kind: output, shape index: {0}]   ;;  %s1132_s3 = inlined_call_operand.vmem [shape: f32[2,2,8], index: 3, kind: output, shape index: {1}]  }
   0x1   :  { %s903_s14 = smov 0   ;;  %s905_s15 = smov 0  }
   0x2   :  { %s907_s16 = smov 0  }
   0x3 LB: > { %s23_s17 = sadd.s32 1, %s868_s14  ;;  %s26_s18 = sadd.s32 1, %s872_s15  ;;  %s876_s16 = sphi %s907_s16, %s14_s16   ;;  %s872_s15 = sphi %s905_s15, %s1136_s15   ;;  %s868_s14 = sphi %s903_s14, %s1135_s14   ;;  %s864_s13 = sphi %s901_s13, %s1134_s13   ;;  %s860_s12 = sphi %s899_s12, %s1133_s12  }
   0x4   : > { %p24_p0 = scmp.ge.s32.totalorder %s23_s17, 2  ;;  %p698_p1 = scmp.ge.s32.totalorder %s876_s16, 1 }
   0x5   : > { %p162_p2 = scmp.lt.s32.totalorder %s876_s16, 5 }
   0x6   : > { %s1138_s17 = smov (%p24_p0, %s23_s17), 0  ;;  %s1140_s18 = smov (!%p24_p0, %s26_s18), %s872_s15 }
   0x7   : > { %p163_p3 = pnand %p698_p1, %p162_p2  ;;  %p28_p4 = scmp.ge.s32.totalorder %s1140_s18, 2 }
   0x8   : > { %v242_v0 = vld [vmem:[%s1130_s1] sm:$0xff] (!%p163_p3)  ;;  %v243_v1 = vld [vmem:[%s1130_s1 + $0x8] sm:$0xff] (!%p163_p3)  ;;  %v244_v2 = vld [vmem:[%s1130_s1 + $0x10] sm:$0xff] (!%p163_p3)  ;;  %s699_s25 = sshll.u32 (!%p163_p3), %s860_s12, 3  ;;  %p201_p5 = scmp.lt.s32.totalorder (!%p163_p3), %s864_s13, 1  ;;  %vm296_vm0 = vcmask (!%p163_p3), 1043456  }
   0x9   : > { %s1142_s18 = smov (%p28_p4, %s1140_s18), 0  ;;  %166 = sbr.rel (%p163_p3) target bundleno = 300 (0x12c), region = 28 }
   0xa   : > { %v783_v3 = vpack.c.bf16 (!%p163_p3), %v243_v1, %v242_v0  ;;  %v245_v4 = vld [vmem:[%s1130_s1 + $0x18] sm:$0xff] (!%p163_p3)  ;;  %p203_p6 = scmp.lt.s32.totalorder (!%p163_p3), %s699_s25, 15  ;;  %v246_v6 = vld [vmem:[%s1130_s1 + $0x20] sm:$0xf] (!%p163_p3)  ;;  %vm247_vm1 = vcmask (!%p163_p3), 293888   ;;  %p725_p7 = scmp.ne.s32.totalorder (!%p163_p3), %s860_s12, 0 }
   0xb   : > { %v787_v5 = vpack.c.bf16 (!%p163_p3), %v245_v4, %v244_v2 }
   0xc   : > { %784 = vmatprep.subr.bf16.mxu0 (!%p163_p3), %v783_v3  ;;  %791 = vmatprep.subr.bf16.mxu1 (!%p163_p3), %v783_v3 }
   0xd   : > { %786 = vmatpush3.bf16.msra.mxu0 (!%p163_p3), %v783_v3  ;;  %794 = vmatpush3.bf16.msra.mxu1 (!%p163_p3), %v783_v3 }
   0xe   : > { %788 = vmatprep.subr.bf16.mxu0 (!%p163_p3), %v787_v5  ;;  %792 = vmatprep.subr.bf16.mxu1 (!%p163_p3), %v787_v5 }
  0x10   : > { %s1144_s13 = smov (!%p201_p5, %s864_s13), 1  ;;  %s1146_s25 = smov (!%p203_p6, %s699_s25), 15 }
  0x11   : > { %s701_s28 = sshll.u32 %s1144_s13, 5  ;;  %s707_s29 = sshll.u32 %s1144_s13, 1  ;;  %790 = vmatpush3.bf16.msra.mxu0 %v787_v5  ;;  %795 = vmatpush3.bf16.msra.mxu1 %v787_v5  ;;  %vm449_vm2 = vcmask (!%p725_p7), 58368   ;;  %v878_v39 = vmov (!%p725_p7), 0.0  }
  0x12   : > { %s700_s30 = sshll.u32 %s1146_s25, 1  ;;  %s947_s6 = scalar_lea.vmem %s1132_s3, %s707_s29  ;;  %757 = vmatprep.subr.msk.mxu0 %vm296_vm0, %v246_v6  ;;  %793 = vmatprep.subr.msk.mxu1 %vm296_vm0, %v246_v6 }
  0x13   : > { %s207_s9 = sadd.s32 %s701_s28, %s700_s30  ;;  %450 = vst.msk [vmem:[%s947_s6] sm:$0x3] (!%p725_p7), %vm449_vm2, %v878_v39 }
  0x14   : > { %s702_s10 = sshll.u32 %s207_s9, 3 }
  0x15   : > { %s955_s19 = scalar_lea.vmem %s1129_s0, %s702_s10  ;;  %s960_s22 = scalar_lea.vmem %s1131_s2, %s702_s10  ;;  %758 = vmatpush3.msk.msra.mxu0 %vm296_vm0, %v246_v6  ;;  %796 = vmatpush3.msk.msra.mxu1 %vm296_vm0, %v246_v6 }
  0x16   : > { %v226_v7 = vld [vmem:[%s955_s19] sm:$0xff]  ;;  %v227_v9 = vld [vmem:[%s955_s19 + $0x8] sm:$0xff]  ;;  %v228_v11 = vld [vmem:[%s955_s19 + $0x10] sm:$0xff] }
  0x17   : > { %v234_v8 = vld [vmem:[%s955_s19 + $0x40] sm:$0xff]  ;;  %759 = vmatprep.mubr.msk.f32.mxu0 %vm247_vm1, %v226_v7  ;;  %v235_v10 = vld [vmem:[%s955_s19 + $0x48] sm:$0xff]  ;;  %v236_v12 = vld [vmem:[%s955_s19 + $0x50] sm:$0xff] }
  0x18   : > { %771 = vmatprep.mubr.msk.f32.mxu1 %vm247_vm1, %v234_v8  ;;  %760 = vmatmul.mubr.msk.f32.vlgmr.msra.gmra.mrb[0].mxu0 %vm247_vm1, %v227_v9  ;;  %v229_v13 = vld [vmem:[%s955_s19 + $0x18] sm:$0xff]  ;;  %v230_v15 = vld [vmem:[%s955_s19 + $0x20] sm:$0xff]  ;;  %v231_v17 = vld [vmem:[%s955_s19 + $0x28] sm:$0xff] }
  0x19   : > { %772 = vmatmul.mubr.msk.f32.vlgmr.msra.gmra.mrb[0].mxu1 %vm247_vm1, %v235_v10  ;;  %762 = vmatprep.mubr.msk.f32.mxu0 %vm247_vm1, %v228_v11  ;;  %v237_v14 = vld [vmem:[%s955_s19 + $0x58] sm:$0xff]  ;;  %v238_v16 = vld [vmem:[%s955_s19 + $0x60] sm:$0xff]  ;;  %v239_v18 = vld [vmem:[%s955_s19 + $0x68] sm:$0xff] }
  0x1a   : > { %774 = vmatprep.mubr.msk.f32.mxu1 %vm247_vm1, %v236_v12  ;;  %v232_v19 = vld [vmem:[%s955_s19 + $0x30] sm:$0xff]  ;;  %v233_v21 = vld [vmem:[%s955_s19 + $0x38] sm:$0xff] }
  0x1b   : > { %v240_v20 = vld [vmem:[%s955_s19 + $0x70] sm:$0xff]  ;;  %v241_v22 = vld [vmem:[%s955_s19 + $0x78] sm:$0xff] }
  0x1c   : > { %763 = vmatmul.mubr.msk.f32.gmra.mrb[2].mxu0 %vm247_vm1, %v229_v13 }
  0x1d   : > { %775 = vmatmul.mubr.msk.f32.gmra.mrb[2].mxu1 %vm247_vm1, %v237_v14  ;;  %765 = vmatprep.mubr.msk.f32.mxu0 %vm247_vm1, %v230_v15 }
  0x1e   : > { %777 = vmatprep.mubr.msk.f32.mxu1 %vm247_vm1, %v238_v16 }
  0x20   : > { %766 = vmatmul.mubr.msk.f32.gmra.mrb[4].mxu0 %vm247_vm1, %v231_v17 }
  0x21   : > { %778 = vmatmul.mubr.msk.f32.gmra.mrb[4].mxu1 %vm247_vm1, %v239_v18  ;;  %768 = vmatprep.mubr.msk.f32.mxu0 %vm247_vm1, %v232_v19 }
  0x22   : > { %780 = vmatprep.mubr.msk.f32.mxu1 %vm247_vm1, %v240_v20 }
  0x24   : > { %769 = vmatmul.mubr.msk.f32.gmra.mrb[6].mxu0 %vm247_vm1, %v233_v21 }
  0x25   : > { %781 = vmatmul.mubr.msk.f32.gmra.mrb[6].mxu1 %vm247_vm1, %v241_v22 }
  0xeb   : > { %v761_v23 = vpop.f32.mrb[0].mxu0 }
  0xec   : > { %v998_v24 = vpop.f32.mrb[0].mxu1  ;;  %v366_v25 = vpop.f32.mrb[1].mxu0 }
  0xed   : > { %v1000_v26 = vpop.f32.mrb[1].mxu1 }
  0xef   : > { %v764_v27 = vpop.f32.mrb[2].mxu0 }
  0xf0   : > { %v1002_v28 = vpop.f32.mrb[2].mxu1  ;;  %v376_v29 = vpop.f32.mrb[3].mxu0 }
  0xf1   : > { %v1004_v30 = vpop.f32.mrb[3].mxu1 }
  0xf3   : > { %v767_v31 = vpop.f32.mrb[4].mxu0  ;;  %448 = sbr.rel (%p725_p7) target bundleno = 250 (0xfa), region = 32 }
  0xf4   : > { %v1006_v32 = vpop.f32.mrb[4].mxu1  ;;  %v386_v33 = vpop.f32.mrb[5].mxu0 }
  0xf5   : > { %v1008_v34 = vpop.f32.mrb[5].mxu1 }
  0xf7   : > { %v770_v35 = vpop.f32.mrb[6].mxu0 }
  0xf8   : > { %v1010_v36 = vpop.f32.mrb[6].mxu1  ;;  %v396_v37 = vpop.f32.mrb[7].mxu0 }
  0xf9   : > { %v1012_v38 = vpop.f32.mrb[7].mxu1 }
  0xfa PF: > { %vm451_vm3 = vcmask 64512   ;;  %v489_v47 = vmul.f32 %v366_v25, %v366_v25  ;;  %v490_v48 = vmul.f32 %v761_v23, %v761_v23  ;;  %v491_v49 = vmul.f32 %v376_v29, %v376_v29 }
  0xfb   : > { %v452_v40 = vsel %vm451_vm3, %v366_v25, 0.0  ;;  %v453_v41 = vsel %vm451_vm3, %v761_v23, 0.0  ;;  %v455_v42 = vsel %vm451_vm3, %v376_v29, 0.0  ;;  %548 = vst.msk [vmem:[%s960_s22] sm:$0xff] %vm451_vm3, %v366_v25  ;;  %549 = vst.msk [vmem:[%s960_s22 + $0x8] sm:$0xff] %vm451_vm3, %v761_v23  ;;  %v457_v44 = vsel %vm451_vm3, %v764_v27, 0.0 }
  0xfc   : > { %550 = vst.msk [vmem:[%s960_s22 + $0x10] sm:$0xff] %vm451_vm3, %v376_v29  ;;  %551 = vst.msk [vmem:[%s960_s22 + $0x18] sm:$0xff] %vm451_vm3, %v764_v27  ;;  %v454_v43 = vadd.f32 %v453_v41, %v452_v40  ;;  %v459_v46 = vsel %vm451_vm3, %v386_v33, 0.0  ;;  %v461_v51 = vsel %vm451_vm3, %v767_v31, 0.0  ;;  %v492_v52 = vmul.f32 %v764_v27, %v764_v27 }
  0xfd   : > { %552 = vst.msk [vmem:[%s960_s22 + $0x20] sm:$0xff] %vm451_vm3, %v386_v33  ;;  %553 = vst.msk [vmem:[%s960_s22 + $0x28] sm:$0xff] %vm451_vm3, %v767_v31  ;;  %v463_v54 = vsel %vm451_vm3, %v396_v37, 0.0  ;;  %v493_v55 = vmul.f32 %v386_v33, %v386_v33  ;;  %v505_v56 = vsel %vm451_vm3, %v489_v47, 0.0  ;;  %v506_v57 = vsel %vm451_vm3, %v490_v48, 0.0 }
  0xfe   : > { %554 = vst.msk [vmem:[%s960_s22 + $0x30] sm:$0xff] %vm451_vm3, %v396_v37  ;;  %555 = vst.msk [vmem:[%s960_s22 + $0x38] sm:$0xff] %vm451_vm3, %v770_v35  ;;  %v456_v45 = vadd.f32 %v455_v42, %v454_v43  ;;  %v508_v58 = vsel %vm451_vm3, %v491_v49, 0.0  ;;  %v507_v60 = vadd.f32 %v506_v57, %v505_v56  ;;  %v465_v61 = vsel %vm451_vm3, %v770_v35, 0.0 }
  0xff   : > { %556 = vst.msk [vmem:[%s960_s22 + $0x40] sm:$0xff] %vm451_vm3, %v1000_v26  ;;  %557 = vst.msk [vmem:[%s960_s22 + $0x48] sm:$0xff] %vm451_vm3, %v998_v24  ;;  %v494_v62 = vmul.f32 %v767_v31, %v767_v31  ;;  %v510_v63 = vsel %vm451_vm3, %v492_v52, 0.0  ;;  %v467_v2 = vsel %vm451_vm3, %v1000_v26, 0.0  ;;  %v495_v3 = vmul.f32 %v396_v37, %v396_v37 }
 0x100   : > { %558 = vst.msk [vmem:[%s960_s22 + $0x50] sm:$0xff] %vm451_vm3, %v1004_v30  ;;  %559 = vst.msk [vmem:[%s960_s22 + $0x58] sm:$0xff] %vm451_vm3, %v1002_v28  ;;  %v458_v50 = vadd.f32 %v457_v44, %v456_v45  ;;  %v509_v1 = vadd.f32 %v508_v58, %v507_v60  ;;  %v512_v4 = vsel %vm451_vm3, %v493_v55, 0.0  ;;  %v469_v7 = vsel %vm451_vm3, %v998_v24, 0.0 }
 0x101   : > { %560 = vst.msk [vmem:[%s960_s22 + $0x60] sm:$0xff] %vm451_vm3, %v1008_v34  ;;  %561 = vst.msk [vmem:[%s960_s22 + $0x68] sm:$0xff] %vm451_vm3, %v1006_v32  ;;  %v496_v8 = vmul.f32 %v770_v35, %v770_v35  ;;  %v514_v9 = vsel %vm451_vm3, %v494_v62, 0.0  ;;  %v471_v12 = vsel %vm451_vm3, %v1004_v30, 0.0  ;;  %v497_v13 = vmul.f32 %v1000_v26, %v1000_v26 }
 0x102   : > { %562 = vst.msk [vmem:[%s960_s22 + $0x70] sm:$0xff] %vm451_vm3, %v1012_v38  ;;  %563 = vst.msk [vmem:[%s960_s22 + $0x78] sm:$0xff] %vm451_vm3, %v1010_v36  ;;  %v460_v53 = vadd.f32 %v459_v46, %v458_v50  ;;  %v511_v6 = vadd.f32 %v510_v63, %v509_v1  ;;  %v516_v14 = vsel %vm451_vm3, %v495_v3, 0.0  ;;  %v473_v17 = vsel %vm451_vm3, %v1002_v28, 0.0 }
 0x103   : > { %v498_v18 = vmul.f32 %v998_v24, %v998_v24  ;;  %v518_v19 = vsel %vm451_vm3, %v496_v8, 0.0  ;;  %v475_v22 = vsel %vm451_vm3, %v1008_v34, 0.0  ;;  %v499_v23 = vmul.f32 %v1004_v30, %v1004_v30 }
 0x104   : > { %v462_v59 = vadd.f32 %v461_v51, %v460_v53  ;;  %v513_v11 = vadd.f32 %v512_v4, %v511_v6  ;;  %v520_v25 = vsel %vm451_vm3, %v497_v13, 0.0  ;;  %v477_v29 = vsel %vm451_vm3, %v1006_v32, 0.0 }
 0x105   : > { %v500_v24 = vmul.f32 %v1002_v28, %v1002_v28  ;;  %v522_v31 = vsel %vm451_vm3, %v498_v18, 0.0  ;;  %v479_v37 = vsel %vm451_vm3, %v1012_v38, 0.0  ;;  %v501_v30 = vmul.f32 %v1008_v34, %v1008_v34 }
 0x106   : > { %v464_v0 = vadd.f32 %v463_v54, %v462_v59  ;;  %v515_v16 = vadd.f32 %v514_v9, %v513_v11  ;;  %v524_v39 = vsel %vm451_vm3, %v499_v23, 0.0  ;;  %v481_v42 = vsel %vm451_vm3, %v1010_v36, 0.0 }
 0x107   : > { %v502_v28 = vmul.f32 %v1006_v32, %v1006_v32  ;;  %v526_v43 = vsel %vm451_vm3, %v500_v24, 0.0  ;;  %v503_v46 = vmul.f32 %v1012_v38, %v1012_v38  ;;  %v528_v47 = vsel %vm451_vm3, %v501_v30, 0.0 }
 0x108   : > { %v466_v5 = vadd.f32 %v465_v61, %v464_v0  ;;  %v517_v21 = vadd.f32 %v516_v14, %v515_v16  ;;  %v504_v49 = vmul.f32 %v1010_v36, %v1010_v36  ;;  %vm543_vm4 = vcmask 1040384  }
 0x109   : > { %v530_v50 = vsel %vm451_vm3, %v502_v28, 0.0  ;;  %v532_v32 = vsel %vm451_vm3, %v503_v46, 0.0  ;;  %vm546_vm5 = vcmask 58368  }
 0x10a   : > { %v468_v10 = vadd.f32 %v467_v2, %v466_v5  ;;  %v519_v27 = vadd.f32 %v518_v19, %v517_v21  ;;  %v534_v55 = vsel %vm451_vm3, %v504_v49, 0.0  ;;  %v542_v2 = vld [vmem:[%s947_s6] sm:$0x3] }
 0x10c   : > { %v470_v15 = vadd.f32 %v469_v7, %v468_v10  ;;  %v521_v35 = vadd.f32 %v520_v25, %v519_v27 }
 0x10e   : > { %v472_v20 = vadd.f32 %v471_v12, %v470_v15  ;;  %v523_v41 = vadd.f32 %v522_v31, %v521_v35 }
 0x110   : > { %v474_v26 = vadd.f32 %v473_v17, %v472_v20  ;;  %v525_v45 = vadd.f32 %v524_v39, %v523_v41 }
 0x112   : > { %v476_v33 = vadd.f32 %v475_v22, %v474_v26  ;;  %v527_v48 = vadd.f32 %v526_v43, %v525_v45 }
 0x114   : > { %v478_v40 = vadd.f32 %v477_v29, %v476_v33  ;;  %v529_v52 = vadd.f32 %v528_v47, %v527_v48 }
 0x116   : > { %v480_v44 = vadd.f32 %v479_v37, %v478_v40  ;;  %v531_v54 = vadd.f32 %v530_v50, %v529_v52 }
 0x118   : > { %v482_v34 = vadd.f32 %v481_v42, %v480_v44  ;;  %v533_v38 = vadd.f32 %v532_v32, %v531_v54 }
 0x11a   : > { %v483_v51 = vrot.slane %v482_v34, 4  ;;  %v535_v57 = vadd.f32 %v534_v55, %v533_v38 }
 0x11c   : > { %v484_v53 = vadd.f32 %v483_v51, %v482_v34  ;;  %v536_v59 = vrot.slane %v535_v57, 4 }
 0x11e   : > { %v485_v56 = vrot.slane %v484_v53, 2  ;;  %v537_v60 = vadd.f32 %v536_v59, %v535_v57 }
 0x120   : > { %v486_v58 = vadd.f32 %v485_v56, %v484_v53  ;;  %v538_v36 = vrot.slane %v537_v60, 2 }
 0x122   : > { %v487_v61 = vrot.slane %v486_v58, 1  ;;  %v539_v62 = vadd.f32 %v538_v36, %v537_v60 }
 0x124   : > { %v488_v63 = vadd.f32 %v487_v61, %v486_v58  ;;  %v540_v0 = vrot.slane %v539_v62, 1 }
 0x126   : > { %v541_v1 = vadd.f32 %v540_v0, %v539_v62 }
 0x128   : > { %v544_v3 = vsel %vm543_vm4, %v488_v63, %v541_v1 }
 0x129   : > { %v545_v4 = vadd.f32 %v544_v3, %v542_v2 }
 0x12b   : > { %547 = vst.msk [vmem:[%s947_s6] sm:$0x3] %vm546_vm5, %v545_v4 }
 0x12c PF: > { %s14_s16 = sadd.s32 1, %s876_s16   ;;  %s1133_s12 = smov %s868_s14 }
 0x12d   : > { %p11_p8 = scmp.ge.s32.totalorder %s14_s16, 6   ;;  %s1134_s13 = smov %s872_s15 }
 0x12e   : > { %s1135_s14 = smov %s1138_s17  ;;  %s1136_s15 = smov %s1142_s18 }
 0x12f   :  { %13 = sbr.rel (!%p11_p8) target bundleno = 3 (0x3), region = 74 }

// kernel: conv_block.3
= control target key start
LH: loop header
LB: loop body
LE: loop exit
PB: predicated region body
PF: predicated region fallthrough
CT: control target
= control target key end

     0   :  { %s523_s12 = smov 0   ;;  %s525_s13 = smov 0   ;;  %s636_s0 = inlined_call_operand.vmem [shape: f32[2,8,2,8,16], index: 0, kind: input, shape index: {}]   ;;  %s637_s1 = inlined_call_operand.vmem [shape: f32[1,16], index: 1, kind: input, shape index: {}]   ;;  %s638_s2 = inlined_call_operand.vmem [shape: f32[1,16], index: 2, kind: input, shape index: {}]   ;;  %s639_s3 = inlined_call_operand.vmem [shape: f32[2,8,8,8], index: 3, kind: output, shape index: {}]  }
   0x1   :  { %s527_s14 = smov 0  }
   0x2 LB: > { %s25_s15 = sadd.s32 1, %s496_s13  ;;  %p442_p0 = scmp.ge.s32.totalorder %s500_s14, 1  ;;  %s500_s14 = sphi %s527_s14, %s13_s14   ;;  %s496_s13 = sphi %s525_s13, %s641_s13   ;;  %s492_s12 = sphi %s523_s12, %s640_s12  }
   0x3   : > { %p27_p1 = scmp.ge.s32.totalorder %s25_s15, 2  ;;  %p159_p2 = scmp.lt.s32.totalorder %s500_s14, 3 }
   0x5   : > { %s643_s15 = smov (%p27_p1, %s25_s15), 0  ;;  %p160_p3 = pnand %p442_p0, %p159_p2 }
   0x6   : > { %p193_p4 = scmp.lt.s32.totalorder (!%p160_p3), %s492_s12, 1  ;;  %v547_v0 = vld [vmem:[%s637_s1] ss:$0 sm:$0xff] (!%p160_p3)  ;;  %s502_s24 = smov (!%p160_p3), 120   ;;  %vm339_vm0 = vcmask (!%p160_p3), 64512  }
   0x7   : > { %163 = sbr.rel (%p160_p3) target bundleno = 157 (0x9d), region = 32  ;;  %v557_v1 = vld [vmem:[%s638_s2] ss:$0 sm:$0xff] (!%p160_p3) }
   0xe   : > { %s645_s12 = smov (!%p193_p4, %s492_s12), 1 }
   0xf   : > { %s451_s16 = sshll.u32 %s645_s12, 7  ;;  %s452_s25 = sshll.u32 %s645_s12, 6 }
  0x10   : > { %s552_s21 = scalar_lea.vmem %s636_s0, %s451_s16  ;;  %s211_s28 = scalar_lea.vmem %s639_s3, %s452_s25 }
  0x11   : > { %v217_v2 = vld [vmem:[%s552_s21 + $0x20] sm:$0xff]  ;;  %v218_v3 = vld [vmem:[%s552_s21 + $0x28] sm:$0xff]  ;;  %v219_v9 = vld [vmem:[%s552_s21 + $0x30] sm:$0xff] }
  0x12   : > { %v213_v4 = vld [vmem:[%s552_s21] sm:$0xff]  ;;  %v240_v5 = vmul.f32 %v547_v0, %v217_v2  ;;  %v241_v6 = vmul.f32 %v547_v0, %v218_v3  ;;  %v214_v7 = vld [vmem:[%s552_s21 + $0x8] sm:$0xff]  ;;  %v220_v10 = vld [vmem:[%s552_s21 + $0x38] sm:$0xff]  ;;  %v242_v12 = vmul.f32 %v547_v0, %v219_v9 }
  0x13   : > { %v236_v8 = vmul.f32 %v547_v0, %v213_v4  ;;  %v237_v11 = vmul.f32 %v547_v0, %v214_v7  ;;  %v243_v13 = vmul.f32 %v547_v0, %v220_v10  ;;  %v215_v14 = vld [vmem:[%s552_s21 + $0x10] sm:$0xff]  ;;  %v216_v15 = vld [vmem:[%s552_s21 + $0x18] sm:$0xff]  ;;  %v221_v30 = vld [vmem:[%s552_s21 + $0x40] sm:$0xff] }
  0x14   : > { %v263_v16 = vadd.f32 %v557_v1, %v240_v5  ;;  %v264_v17 = vadd.f32 %v557_v1, %v241_v6  ;;  %v238_v19 = vmul.f32 %v547_v0, %v215_v14  ;;  %v265_v21 = vadd.f32 %v557_v1, %v242_v12  ;;  %v223_v24 = vld [vmem:[%s552_s21 + $0x50] sm:$0xff]  ;;  %v224_v25 = vld [vmem:[%s552_s21 + $0x58] sm:$0xff]  ;;  %v222_v35 = vld [vmem:[%s552_s21 + $0x48] sm:$0xff] }
  0x15   : > { %v259_v18 = vadd.f32 %v557_v1, %v236_v8  ;;  %v260_v20 = vadd.f32 %v557_v1, %v237_v11  ;;  %v266_v22 = vadd.f32 %v557_v1, %v243_v13  ;;  %v239_v23 = vmul.f32 %v547_v0, %v216_v15  ;;  %v227_v36 = vld [vmem:[%s552_s21 + $0x70] sm:$0xff]  ;;  %v228_v41 = vld [vmem:[%s552_s21 + $0x78] sm:$0xff]  ;;  %v225_v42 = vld [vmem:[%s552_s21 + $0x60] sm:$0xff] }
  0x16   : > { %v279_v26 = vmax.f32 %v263_v16, 0.0  ;;  %v280_v27 = vmax.f32 %v264_v17, 0.0  ;;  %v261_v29 = vadd.f32 %v557_v1, %v238_v19  ;;  %v281_v32 = vmax.f32 %v265_v21, 0.0  ;;  %v226_v51 = vld [vmem:[%s552_s21 + $0x68] sm:$0xff] }
  0x17   : > { %v275_v28 = vmax.f32 %v259_v18, 0.0  ;;  %v276_v31 = vmax.f32 %v260_v20, 0.0  ;;  %v282_v33 = vmax.f32 %v266_v22, 0.0  ;;  %v262_v34 = vadd.f32 %v557_v1, %v239_v23 }
  0x18   : > { %v293_v37 = vmax.f32 %v279_v26, %v280_v27  ;;  %v277_v38 = vmax.f32 %v261_v29, 0.0  ;;  %v246_v39 = vmul.f32 %v547_v0, %v223_v24  ;;  %v247_v40 = vmul.f32 %v547_v0, %v224_v25 }
  0x19   : > { %v291_v43 = vmax.f32 %v275_v28, %v276_v31  ;;  %v294_v44 = vmax.f32 %v281_v32, %v282_v33  ;;  %v278_v45 = vmax.f32 %v262_v34, 0.0  ;;  %v244_v46 = vmul.f32 %v547_v0, %v221_v30 }
  0x1a   : > { %311 = vrot.lane.b32.xlu1 %v293_v37, %s502_s24  ;;  %v269_v47 = vadd.f32 %v557_v1, %v246_v39  ;;  %v270_v48 = vadd.f32 %v557_v1, %v247_v40  ;;  %v245_v49 = vmul.f32 %v547_v0, %v222_v35  ;;  %v250_v50 = vmul.f32 %v547_v0, %v227_v36 }
  0x1b   : > { %307 = vrot.lane.b32.xlu0 %v291_v43, %s502_s24  ;;  %v292_v52 = vmax.f32 %v277_v38, %v278_v45  ;;  %v267_v53 = vadd.f32 %v557_v1, %v244_v46  ;;  %v251_v54 = vmul.f32 %v547_v0, %v228_v41  ;;  %v248_v55 = vmul.f32 %v547_v0, %v225_v42 }
  0x1c   : > { %v285_v56 = vmax.f32 %v269_v47, 0.0  ;;  %v286_v57 = vmax.f32 %v270_v48, 0.0  ;;  %v268_v58 = vadd.f32 %v557_v1, %v245_v49  ;;  %v273_v59 = vadd.f32 %v557_v1, %v250_v50 }
  0x1d   : > { %v283_v60 = vmax.f32 %v267_v53, 0.0  ;;  %v274_v61 = vadd.f32 %v557_v1, %v251_v54  ;;  %v249_v62 = vmul.f32 %v547_v0, %v226_v51  ;;  %v271_v63 = vadd.f32 %v557_v1, %v248_v55 }
  0x1e   : > { %313 = vrot.lane.b32.xlu1 %v294_v44, %s502_s24  ;;  %v296_v2 = vmax.f32 %v285_v56, %v286_v57  ;;  %v284_v3 = vmax.f32 %v268_v58, 0.0  ;;  %v289_v4 = vmax.f32 %v273_v59, 0.0 }
  0x1f   : > { %309 = vrot.lane.b32.xlu0 %v292_v52, %s502_s24  ;;  %v290_v5 = vmax.f32 %v274_v61, 0.0  ;;  %v272_v6 = vadd.f32 %v557_v1, %v249_v62  ;;  %v287_v7 = vmax.f32 %v271_v63, 0.0 }
  0x20   : > { %v295_v8 = vmax.f32 %v283_v60, %v284_v3 }
  0x21   : > { %v288_v9 = vmax.f32 %v272_v6, 0.0  ;;  %v298_v10 = vmax.f32 %v289_v4, %v290_v5 }
  0x22   : > { %317 = vrot.lane.b32.xlu1 %v296_v2, %s502_s24 }
  0x23   : > { %315 = vrot.lane.b32.xlu0 %v295_v8, %s502_s24  ;;  %v297_v0 = vmax.f32 %v287_v7, %v288_v9 }
  0x26   : > { %321 = vrot.lane.b32.xlu1 %v298_v10, %s502_s24 }
  0x27   : > { %319 = vrot.lane.b32.xlu0 %v297_v0, %s502_s24 }
  0x8c   : > { %v312_v1 = vpop.permute.xlu1 %311 }
  0x8d   : > { %v333_v11 = vmax.f32 %v293_v37, %v312_v1  ;;  %v308_v12 = vpop.permute.xlu0 %307 }
  0x8e   : > { %v331_v13 = vmax.f32 %v291_v43, %v308_v12 }
  0x8f   : > { %342 = vst.msk [vmem:[%s211_s28 + $0x10] sm:$0xff] %vm339_vm0, %v333_v11 }
  0x90   : > { %340 = vst.msk [vmem:[%s211_s28] sm:$0xff] %vm339_vm0, %v331_v13  ;;  %v314_v14 = vpop.permute.xlu1 %313 }
  0x91   : > { %v334_v15 = vmax.f32 %v294_v44, %v314_v14  ;;  %v310_v16 = vpop.permute.xlu0 %309 }
  0x92   : > { %v332_v17 = vmax.f32 %v292_v52, %v310_v16 }
  0x93   : > { %343 = vst.msk [vmem:[%s211_s28 + $0x18] sm:$0xff] %vm339_vm0, %v334_v15 }
  0x94   : > { %341 = vst.msk [vmem:[%s211_s28 + $0x8] sm:$0xff] %vm339_vm0, %v332_v17  ;;  %v318_v18 = vpop.permute.xlu1 %317 }
  0x95   : > { %v336_v19 = vmax.f32 %v296_v2, %v318_v18  ;;  %v316_v20 = vpop.permute.xlu0 %315 }
  0x96   : > { %v335_v21 = vmax.f32 %v295_v8, %v316_v20 }
  0x97   : > { %345 = vst.msk [vmem:[%s211_s28 + $0x28] sm:$0xff] %vm339_vm0, %v336_v19 }
  0x98   : > { %344 = vst.msk [vmem:[%s211_s28 + $0x20] sm:$0xff] %vm339_vm0, %v335_v21  ;;  %v322_v22 = vpop.permute.xlu1 %321 }
  0x99   : > { %v338_v23 = vmax.f32 %v298_v10, %v322_v22  ;;  %v320_v24 = vpop.permute.xlu0 %319 }
  0x9a   : > { %v337_v25 = vmax.f32 %v297_v0, %v320_v24 }
  0x9b   : > { %347 = vst.msk [vmem:[%s211_s28 + $0x38] sm:$0xff] %vm339_vm0, %v338_v23 }
  0x9c   : > { %346 = vst.msk [vmem:[%s211_s28 + $0x30] sm:$0xff] %vm339_vm0, %v337_v25 }
  0x9d PF: > { %s13_s14 = sadd.s32 1, %s500_s14   ;;  %s640_s12 = smov %s496_s13 }
  0x9e   : > { %p10_p5 = scmp.ge.s32.totalorder %s13_s14, 4   ;;  %s641_s13 = smov %s643_s15 }
  0xa0   :  { %12 = sbr.rel (!%p10_p5) target bundleno = 2 (0x2), region = 62 }

</bundles_post_ra>
